<compile_context>
chip_gen: v7x
topology: tpu7x:2x2x1
jax: 0.10.0
libtpu: 0.0.40
codegen_flags: <defaults>
</compile_context>

<pallas_src>
import functools

import jax
import jax.numpy as jnp
from jax.experimental import pallas as pl
from jax.experimental.pallas import tpu as pltpu

_LANES = 128
_MAX_TILE_ROWS = 8192


def _pack_factor(B, D):
    """How many samples to pack per 128-lane row (free row-major reshape)."""
    if D % _LANES == 0:
        return 1                               # already lane-dense
    if _LANES % D == 0 and B % (_LANES // D) == 0:
        return _LANES // D                     # pack P samples per row
    return 1                                   # fallback: correct, lane-sparse


def _round_up(x, m):
    return ((x + m - 1) // m) * m


def _device_budget():
    """(per-input block bytes, vmem_limit_bytes) for this TPU generation."""
    kind = ""
    try:
        kind = jax.devices()[0].device_kind.lower()
    except Exception:
        pass
    if "v7" in kind or "7x" in kind:
        # v7x: 64 MiB VMEM per TensorCore -> 3 inputs x 2 buffers x 2 MiB + temps.
        return 2 * 1024 * 1024, 48 * 1024 * 1024
    # v5e / v6e (128 MiB VMEM): bigger tiles amortize the ~0.35 us/step overhead.
    return 4 * 1024 * 1024, 80 * 1024 * 1024


def _triplet_kernel(a_ref, p_ref, n_ref, sel_ref, out_ref, *,
                    TR, S, S_total, last_rows):
    c = pl.program_id(0)   # chunk ("parallel" -> one per TensorCore on v7x)
    s = pl.program_id(1)   # reduction step within the chunk ("arbitrary")

    # Zero this chunk's resident accumulator block at its first step.
    @pl.when(s == 0)
    def _():
        out_ref[...] = jnp.zeros_like(out_ref)

    a = a_ref[...].astype(jnp.float32)
    sel = sel_ref[...]                          # resident (C,128) 0/1 selector

    # Per-sample (segmented) sum of squares as one MXU matmul per distance.
    d = a - p_ref[...].astype(jnp.float32)
    dp2 = jnp.dot(d * d, sel, preferred_element_type=jnp.float32)   # (TR, 128)
    d = a - n_ref[...].astype(jnp.float32)
    dn2 = jnp.dot(d * d, sel, preferred_element_type=jnp.float32)   # (TR, 128)

    x = jnp.sqrt(dp2) - jnp.sqrt(dn2)
    # Numerically stable softplus == log(1 + exp(x)) wherever finite.
    loss = jnp.maximum(x, 0.0) + jnp.log1p(jnp.exp(-jnp.abs(x)))

    def fold(v):
        # (TR, 128) -> (1, 128) per-lane partial (vreg adds + one sublane fold);
        # padded lanes (>= P) are sliced away in the wrapper.
        return jnp.sum(v, axis=0, keepdims=True)

    if last_rows == TR:
        # Every tile is full: no per-step masking at all.
        out_ref[...] += fold(loss)[None]
    else:
        t = c * S + s                           # global tile index

        @pl.when(t < S_total - 1)
        def _():
            out_ref[...] += fold(loss)[None]

        @pl.when(t == S_total - 1)
        def _():
            # Only the single, globally-last tile is partial: mask rows past the
            # end of the batch (DMA-padded rows may hold arbitrary finite/NaN
            # garbage; the where() zeroes them before accumulation).
            rid = jax.lax.broadcasted_iota(jnp.int32, (TR, _LANES), 0)
            out_ref[...] += fold(jnp.where(rid < last_rows, loss, 0.0))[None]


def triplet_loss(anchor, positive, negative, size_average: bool = True,
                 block_rows=None):
    """anchor, positive, negative: (B, D) arrays (f32 or bf16). Returns f32 scalar.

    block_rows optionally caps the row-tile size (testing / tuning knob)."""
    B, D = anchor.shape
    assert positive.shape == (B, D) and negative.shape == (B, D)

    # Lane-dense packing: free row-major reshape (B, D) -> (R, P*D).
    P = _pack_factor(B, D)
    R, C = B // P, P * D
    a2 = anchor.reshape(R, C)
    p2 = positive.reshape(R, C)
    n2 = negative.reshape(R, C)

    itemsize = jnp.dtype(anchor.dtype).itemsize
    sub = max(8, 32 // itemsize)               # native sublane multiple for dtype
    block_bytes, vmem_limit = _device_budget()

    # Row-tile size: per-generation VMEM budget, rounded to the sublane multiple.
    tr = block_bytes // max(1, C * itemsize)
    if block_rows is not None:
        tr = min(tr, int(block_rows))
    tr = max(sub, min(_MAX_TILE_ROWS, (tr // sub) * sub))

    if R <= tr:
        TR = R                                  # single full-extent tile
        S_total = 1
    else:
        TR = tr
        S_total = pl.cdiv(R, TR)

    # Chunk split: NC=2 (one chunk per v7x TensorCore) only when the tile count
    # divides evenly -- shrink the tile to make it even when cheap -- so no
    # clamped / overshoot tiles are ever DMA'd.
    NC = 1
    if S_total >= 2:
        if S_total % 2 == 0:
            NC = 2
        else:
            tr2 = _round_up(pl.cdiv(R, S_total + 1), sub)
            if tr2 >= sub and pl.cdiv(R, tr2) % 2 == 0:
                TR = tr2
                S_total = pl.cdiv(R, TR)
                NC = 2
    S = S_total // NC
    last_rows = R - (S_total - 1) * TR          # rows valid in the last tile

    # Constant 0/1 selector: sel[k, j] = 1 iff lane k belongs to packed sample j
    # (and j < P).  Hoisted out of the kernel body; DMA'd once and resident.
    k_idx = jnp.arange(C)[:, None]
    j_idx = jnp.arange(_LANES)[None, :]
    sel = ((j_idx < P) & (k_idx >= j_idx * D)
           & (k_idx < (j_idx + 1) * D)).astype(jnp.float32)

    def in_map(c, s):
        return (c * S + s, 0)

    in_spec = pl.BlockSpec((TR, C), in_map)
    sel_spec = pl.BlockSpec((C, _LANES), lambda c, s: (0, 0))   # constant -> resident

    kernel = functools.partial(_triplet_kernel, TR=TR, S=S, S_total=S_total,
                               last_rows=last_rows)

    partials = pl.pallas_call(
        kernel,
        out_shape=jax.ShapeDtypeStruct((NC, 1, _LANES), jnp.float32),
        grid_spec=pltpu.PrefetchScalarGridSpec(
            num_scalar_prefetch=0,
            grid=(NC, S),
            in_specs=[in_spec, in_spec, in_spec, sel_spec],
            out_specs=pl.BlockSpec((1, 1, _LANES), lambda c, s: (c, 0, 0)),
        ),
        compiler_params=pltpu.CompilerParams(
            dimension_semantics=("parallel", "arbitrary"),
            vmem_limit_bytes=vmem_limit,
        ),
    )(a2, p2, n2, sel)

    # Lane j < P of each chunk's partial holds the sum of that sample slot's
    # losses; lanes >= P are padding (softplus(0) garbage) and are sliced away.
    total = jnp.sum(partials[:, :, :P])
    return total / B if size_average else total


def triplet_loss_ref(anchor, positive, negative, size_average: bool = True):
    """Pure-JAX reference mirroring the PyTorch module."""
    dp = jnp.sqrt(jnp.sum((anchor - positive) ** 2, axis=-1))
    dn = jnp.sqrt(jnp.sum((anchor - negative) ** 2, axis=-1))
    losses = jnp.log1p(jnp.exp(dp - dn))
    return jnp.mean(losses) if size_average else jnp.sum(losses)


def _check(B, D, key, block_rows=None):
    k_a, k_p, k_n = jax.random.split(key, 3)
    anchor = jax.random.normal(k_a, (B, D), dtype=jnp.float32)
    positive = jax.random.normal(k_p, (B, D), dtype=jnp.float32)
    negative = jax.random.normal(k_n, (B, D), dtype=jnp.float32)
    for size_average in (True, False):
        out = jax.block_until_ready(
            triplet_loss(anchor, positive, negative, size_average=size_average,
                         block_rows=block_rows))
        ref = triplet_loss_ref(anchor, positive, negative,
                               size_average=size_average)
        assert jnp.allclose(out, ref, rtol=1e-4, atol=1e-5), (
            B, D, size_average, out, ref)


if __name__ == "__main__":
    key = jax.random.PRNGKey(0)
    k0, k1, k2, k3 = jax.random.split(key, 4)
    # Small shape implied by the module: batch of 8 embeddings, hidden 32
    # (exercises the lane-dense packing path, P = 4, single tiny tile).
    _check(8, 32, k0)
    # Already lane-dense path (D multiple of 128, P = 1, no packing).
    _check(64, 256, k1)
    # Multi-tile path: even tile count -> 2-chunk "parallel" split, resident
    # accumulators, and a partial (masked) last tile.  R=5000, TR=512 -> 2x5.
    _check(20000, 32, k2, block_rows=512)
    # Odd tile count -> tile shrink so the 2-chunk split covers the batch with
    # no overshoot/clamped tiles.  R=5000, TR=560->504 -> 10 tiles -> 2x5.
    _check(20000, 32, k3, block_rows=560)
    print("KERNEL_OK")
</pallas_src>

<mosaic_0001>
module attributes {stable_mosaic.version = 11 : i64} {
  func.func @_triplet_kernel(%arg0: i32, %arg1: i32, %arg2: memref<2x128xf32, #tpu.memory_space<vmem>>, %arg3: memref<2x128xf32, #tpu.memory_space<vmem>>, %arg4: memref<2x128xf32, #tpu.memory_space<vmem>>, %arg5: memref<128x128xf32, #tpu.memory_space<vmem>>, %arg6: memref<1x1x128xf32, #tpu.memory_space<vmem>>) attributes {dimension_semantics = [#tpu.dimension_semantics<parallel>, #tpu.dimension_semantics<arbitrary>], iteration_bounds = array<i64: 1, 1>, scalar_prefetch = 0 : i64, scratch_operands = 0 : i64, tpu.core_type = #tpu.core_type<tc>, window_params = [{transform_indices = @transform_0, window_bounds = array<i64: 2, 128>}, {transform_indices = @transform_1, window_bounds = array<i64: 2, 128>}, {transform_indices = @transform_2, window_bounds = array<i64: 2, 128>}, {pipeline_mode = #tpu.pipeline_mode<synchronous>, transform_indices = @transform_3, window_bounds = array<i64: 128, 128>}, {transform_indices = @transform_4, window_bounds = array<i64: 1, 1, 128>}]} {
    %c0_i32 = arith.constant 0 : i32
    %0 = arith.cmpi eq, %arg1, %c0_i32 : i32
    %1 = arith.extui %0 : i1 to i32
    %c0_i32_0 = arith.constant 0 : i32
    %2 = arith.cmpi ne, %1, %c0_i32_0 : i32
    scf.if %2 {
      %cst_18 = arith.constant 0.000000e+00 : f32
      %30 = vector.broadcast %cst_18 : f32 to vector<1x1x128xf32>
      %c0_19 = arith.constant 0 : index
      %c0_20 = arith.constant 0 : index
      %c0_21 = arith.constant 0 : index
      %31 = vector.load %arg6[%c0_19, %c0_20, %c0_21] : memref<1x1x128xf32, #tpu.memory_space<vmem>>, vector<1x1x128xf32>
      tpu.vector_store %arg6[%c0_19, %c0_20, %c0_21], %30 {strides = array<i32>} : memref<1x1x128xf32, #tpu.memory_space<vmem>>, vector<1x1x128xf32>,
    } else {
    }
    %c0 = arith.constant 0 : index
    %c0_1 = arith.constant 0 : index
    %3 = vector.load %arg2[%c0, %c0_1] : memref<2x128xf32, #tpu.memory_space<vmem>>, vector<2x128xf32>
    %c0_2 = arith.constant 0 : index
    %c0_3 = arith.constant 0 : index
    %4 = vector.load %arg5[%c0_2, %c0_3] : memref<128x128xf32, #tpu.memory_space<vmem>>, vector<128x128xf32>
    %c0_4 = arith.constant 0 : index
    %c0_5 = arith.constant 0 : index
    %5 = vector.load %arg3[%c0_4, %c0_5] : memref<2x128xf32, #tpu.memory_space<vmem>>, vector<2x128xf32>
    %6 = arith.subf %3, %5 : vector<2x128xf32>
    %7 = arith.mulf %6, %6 : vector<2x128xf32>
    %cst = arith.constant dense<0.000000e+00> : vector<2x128xf32>
    %8 = tpu.matmul %7, %4, %cst {dimension_numbers = #tpu.dot_dimension_numbers<[1], [0], [0], [1], [0, 0, 1, 1], [], []>} : vector<2x128xf32>, vector<128x128xf32>, vector<2x128xf32> -> vector<2x128xf32>
    %c0_6 = arith.constant 0 : index
    %c0_7 = arith.constant 0 : index
    %9 = vector.load %arg4[%c0_6, %c0_7] : memref<2x128xf32, #tpu.memory_space<vmem>>, vector<2x128xf32>
    %10 = arith.subf %3, %9 : vector<2x128xf32>
    %11 = arith.mulf %10, %10 : vector<2x128xf32>
    %cst_8 = arith.constant dense<0.000000e+00> : vector<2x128xf32>
    %12 = tpu.matmul %11, %4, %cst_8 {dimension_numbers = #tpu.dot_dimension_numbers<[1], [0], [0], [1], [0, 0, 1, 1], [], []>} : vector<2x128xf32>, vector<128x128xf32>, vector<2x128xf32> -> vector<2x128xf32>
    %13 = math.sqrt %8 : vector<2x128xf32>
    %14 = math.sqrt %12 : vector<2x128xf32>
    %15 = arith.subf %13, %14 : vector<2x128xf32>
    %cst_9 = arith.constant 0.000000e+00 : f32
    %16 = vector.broadcast %cst_9 : f32 to vector<2x128xf32>
    %17 = arith.maximumf %15, %16 : vector<2x128xf32>
    %18 = math.absf %15 : vector<2x128xf32>
    %cst_10 = arith.constant 0.000000e+00 : f32
    %19 = vector.broadcast %cst_10 : f32 to vector<2x128xf32>
    %20 = arith.subf %19, %18 : vector<2x128xf32>
    %21 = math.exp %20 : vector<2x128xf32>
    %22 = math.log1p %21 : vector<2x128xf32>
    %23 = arith.addf %17, %22 : vector<2x128xf32>
    %c0_11 = arith.constant 0 : index
    %c0_12 = arith.constant 0 : index
    %c0_13 = arith.constant 0 : index
    %24 = vector.load %arg6[%c0_11, %c0_12, %c0_13] : memref<1x1x128xf32, #tpu.memory_space<vmem>>, vector<1x1x128xf32>
    %cst_14 = arith.constant dense<0.000000e+00> : vector<128xf32>
    %25 = vector.multi_reduction <add>, %23, %cst_14 [0] : vector<2x128xf32> to vector<128xf32>
    %26 = vector.shape_cast %25 : vector<128xf32> to vector<1x128xf32>
    %27 = vector.shape_cast %26 : vector<1x128xf32> to vector<1x1x128xf32>
    %28 = arith.addf %24, %27 : vector<1x1x128xf32>
    %c0_15 = arith.constant 0 : index
    %c0_16 = arith.constant 0 : index
    %c0_17 = arith.constant 0 : index
    %29 = vector.load %arg6[%c0_15, %c0_16, %c0_17] : memref<1x1x128xf32, #tpu.memory_space<vmem>>, vector<1x1x128xf32>
    tpu.vector_store %arg6[%c0_15, %c0_16, %c0_17], %28 {strides = array<i32>} : memref<1x1x128xf32, #tpu.memory_space<vmem>>, vector<1x1x128xf32>,
    return
  }
  func.func @transform_0(%arg0: i32, %arg1: i32) -> (i32, i32) {
    %c1_i32 = arith.constant 1 : i32
    %0 = arith.muli %arg0, %c1_i32 : i32
    %1 = arith.addi %0, %arg1 : i32
    %c0_i32 = arith.constant 0 : i32
    %c0_i32_0 = arith.constant 0 : i32
    return %1, %c0_i32 : i32, i32
  }
  func.func @transform_1(%arg0: i32, %arg1: i32) -> (i32, i32) {
    %c1_i32 = arith.constant 1 : i32
    %0 = arith.muli %arg0, %c1_i32 : i32
    %1 = arith.addi %0, %arg1 : i32
    %c0_i32 = arith.constant 0 : i32
    %c0_i32_0 = arith.constant 0 : i32
    return %1, %c0_i32 : i32, i32
  }
  func.func @transform_2(%arg0: i32, %arg1: i32) -> (i32, i32) {
    %c1_i32 = arith.constant 1 : i32
    %0 = arith.muli %arg0, %c1_i32 : i32
    %1 = arith.addi %0, %arg1 : i32
    %c0_i32 = arith.constant 0 : i32
    %c0_i32_0 = arith.constant 0 : i32
    return %1, %c0_i32 : i32, i32
  }
  func.func @transform_3(%arg0: i32, %arg1: i32) -> (i32, i32) {
    %c0_i32 = arith.constant 0 : i32
    %c0_i32_0 = arith.constant 0 : i32
    %c0_i32_1 = arith.constant 0 : i32
    return %c0_i32, %c0_i32_0 : i32, i32
  }
  func.func @transform_4(%arg0: i32, %arg1: i32) -> (i32, i32, i32) {
    %c0_i32 = arith.constant 0 : i32
    %c0_i32_0 = arith.constant 0 : i32
    %c0_i32_1 = arith.constant 0 : i32
    return %arg0, %c0_i32, %c0_i32_0 : i32, i32, i32
  }
}

</mosaic_0001>

<bundles_post_ra>
// kernel: tpu_custom_call.1
= control target key start
LH: loop header
LB: loop body
LE: loop exit
PB: predicated region body
PF: predicated region fallthrough
CT: control target
= control target key end

     0   :  { %9 = vsyncpa [#allocation3], 0  ;;  %s711_s0 = inlined_call_operand.hbm [shape: f32[2,128], index: 0, kind: input, shape index: {}]   ;;  %s712_s1 = inlined_call_operand.hbm [shape: f32[2,128], index: 1, kind: input, shape index: {}]   ;;  %s713_s2 = inlined_call_operand.hbm [shape: f32[2,128], index: 2, kind: input, shape index: {}]   ;;  %s714_s3 = inlined_call_operand.hbm [shape: f32[128,128], index: 3, kind: input, shape index: {}]   ;;  %s715_s4 = inlined_call_operand.hbm [shape: f32[1,1,128], index: 4, kind: output, shape index: {}]  }
   0x1   :  { %10 = vsyncpa [#allocation6], 0 }
   0x2   :  { %11 = vsyncpa [#allocation9], 0 }
   0x3   :  { %12 = vsyncpa [#allocation4], 0  ;;  %s593_s15 = smov [#allocation5]   ;;  %s594_s17 = smov [#allocation2]  }
   0x4   :  { %s35_s16 = sshll.u32 %s593_s15, 4  ;;  %s22_s18 = sshll.u32 %s594_s17, 4  ;;  %s36_s16 = int_to_ptr.vmem [resolvable:$true] %s35_s16  ;;  %s23_s18 = int_to_ptr.vmem [resolvable:$true] %s22_s18 }
   0x5   :  { %s475_s21 = scalar_lea.hbm %s712_s1, 32 }
   0x6   :  { %p476_p0 = scmp.ne.s32.totalorder %s712_s1, %s475_s21  ;;  %p479_p1 = scmp.lt.u32.totalorder %s475_s21, %s712_s1 }
   0x8   :  { %p481_p2 = pnand %p479_p1, %p476_p0 }
   0xa   :  { %484 = shalt.err (!%p481_p2)
}
   0xb   :  { %s485_s26 = scalar_lea.vmem %s36_s16, 32  ;;  %p490_p4 = scmp.lt.s32.totalorder %s36_s16, %s36_s16 }
   0xc   :  { %p486_p3 = scmp.ne.s32.totalorder %s36_s16, %s485_s26  ;;  %p491_p5 = scmp.lt.s32.totalorder %s485_s26, %s485_s26 }
   0xe   :  { %p492_p6 = por %p491_p5, %p490_p4 }
  0x10   :  { %p493_p7 = pnand %p492_p6, %p486_p3 }
  0x12   :  { %496 = shalt.err (!%p493_p7)
}
  0x13   :  { %38 = dma.hbm_to_vmem [thread:$0]  %s712_s1, 32, %s36_s16, [#allocation6]  }
  0x14   :  { %s497_s5 = scalar_lea.hbm %s711_s0, 32 }
  0x15   :  { %p498_p8 = scmp.ne.s32.totalorder %s711_s0, %s497_s5  ;;  %p501_p9 = scmp.lt.u32.totalorder %s497_s5, %s711_s0 }
  0x17   :  { %p503_p10 = pnand %p501_p9, %p498_p8 }
  0x19   :  { %506 = shalt.err (!%p503_p10)
}
  0x1a   :  { %s507_s10 = scalar_lea.vmem %s23_s18, 32  ;;  %p512_p12 = scmp.lt.s32.totalorder %s23_s18, %s23_s18 }
  0x1b   :  { %p508_p11 = scmp.ne.s32.totalorder %s23_s18, %s507_s10  ;;  %p513_p13 = scmp.lt.s32.totalorder %s507_s10, %s507_s10 }
  0x1d   :  { %p514_p0 = por %p513_p13, %p512_p12 }
  0x1f   :  { %p515_p1 = pnand %p514_p0, %p508_p11 }
  0x21   :  { %518 = shalt.err (!%p515_p1)
}
  0x22   :  { %25 = dma.hbm_to_vmem [thread:$0]  %s711_s0, 32, %s23_s18, [#allocation3]  }
  0x23   :  { %s595_s12 = smov [#allocation7]   ;;  %s596_s14 = smov [#allocation8]  }
  0x24   :  { %s48_s13 = sshll.u32 %s595_s12, 4  ;;  %s57_s15 = sshll.u32 %s596_s14, 4  ;;  %s49_s13 = int_to_ptr.vmem [resolvable:$true] %s48_s13  ;;  %s652_s15 = int_to_ptr.vmem [resolvable:$true] %s57_s15 }
  0x25   :  { %s519_s19 = scalar_lea.hbm %s713_s2, 32 }
  0x26   :  { %p520_p2 = scmp.ne.s32.totalorder %s713_s2, %s519_s19  ;;  %p523_p3 = scmp.lt.u32.totalorder %s519_s19, %s713_s2 }
  0x28   :  { %p525_p4 = pnand %p523_p3, %p520_p2 }
  0x2a   :  { %528 = shalt.err (!%p525_p4)
}
  0x2b   :  { %s529_s0 = scalar_lea.vmem %s49_s13, 32  ;;  %p534_p6 = scmp.lt.s32.totalorder %s49_s13, %s49_s13 }
  0x2c   :  { %p530_p5 = scmp.ne.s32.totalorder %s49_s13, %s529_s0  ;;  %p535_p7 = scmp.lt.s32.totalorder %s529_s0, %s529_s0 }
  0x2e   :  { %p536_p8 = por %p535_p7, %p534_p6 }
  0x30   :  { %p537_p9 = pnand %p536_p8, %p530_p5 }
  0x32   :  { %540 = shalt.err (!%p537_p9)
}
  0x33   :  { %51 = dma.hbm_to_vmem [thread:$0]  %s713_s2, 32, %s49_s13, [#allocation6]  }
  0x34   :  { %s541_s27 = scalar_lea.hbm %s714_s3, 2048 }
  0x35   :  { %p542_p10 = scmp.ne.s32.totalorder %s714_s3, %s541_s27  ;;  %p545_p11 = scmp.lt.u32.totalorder %s541_s27, %s714_s3 }
  0x37   :  { %p547_p12 = pnand %p545_p11, %p542_p10 }
  0x39   :  { %550 = shalt.err (!%p547_p12)
}
  0x3a   :  { %s551_s6 = scalar_lea.vmem %s652_s15, 2048  ;;  %p556_p0 = scmp.lt.s32.totalorder %s652_s15, %s652_s15 }
  0x3b   :  { %p552_p13 = scmp.ne.s32.totalorder %s652_s15, %s551_s6  ;;  %p557_p1 = scmp.lt.s32.totalorder %s551_s6, %s551_s6 }
  0x3d   :  { %p558_p2 = por %p557_p1, %p556_p0 }
  0x3f   :  { %p559_p3 = pnand %p558_p2, %p552_p13 }
  0x41   :  { %562 = shalt.err (!%p559_p3)
}
  0x42   :  { %s597_s2 = smov 128   ;;  %s598_s7 = smov 8  }
  0x43   :  { %63 = dma.hbm_to_vmem [thread:$0]  %s714_s3, 2048, %s652_s15, [#allocation9], %s597_s2, %s597_s2, %s598_s7  }
  0x44   :  { %585 = dma.done.wait [#allocation3], 32  }
  0x45   :  { %586 = vsyncadd [#allocation3], 4294967264 }
  0x46   :  { %587 = dma.done.wait [#allocation6], 64  }
  0x47   :  { %588 = vsyncadd [#allocation6], 4294967232 }
  0x48   :  { %589 = dma.done.wait [#allocation9], 2048  }
  0x49   :  { %590 = vsyncadd [#allocation9], 4294965248  ;;  %v599_v0 = vmov 0.0|0.0   ;;  %v600_v1 = vmov 0.0   ;;  %vm601_vm0 = vmmov 0   ;;  %v85_v2 = vld [vmem:[#allocation8] sm:$0xff] }
  0x4a   :  { %409 = vmatprep.subr.bf16.mxu0 %v599_v0  ;;  %433 = vmatprep.subr.bf16.mxu1 %v599_v0  ;;  %83 = vst [vmem:[#allocation10] sm:$0x1] %v600_v1  ;;  %v86_v3 = vld [vmem:[#allocation8 + $0x8] sm:$0xff]  ;;  %v87_v4 = vld [vmem:[#allocation8 + $0x10] sm:$0xff]  ;;  %v88_v6 = vld [vmem:[#allocation8 + $0x18] sm:$0xff]  ;;  %vm278_vm6 = vcmask 1041408  }
  0x4b   :  { %371 = vmatprep.mubr.msk.f32.mxu0 %vm601_vm0, %v600_v1  ;;  %406 = vmatprep.mubr.msk.f32.mxu1 %vm601_vm0, %v600_v1  ;;  %v410_v5 = vpack.c.bf16 %v86_v3, %v85_v2  ;;  %v413_v7 = vpack.c.bf16 %v88_v6, %v87_v4  ;;  %v89_v8 = vld [vmem:[#allocation8 + $0x20] sm:$0xff]  ;;  %v90_v9 = vld [vmem:[#allocation8 + $0x28] sm:$0xff]  ;;  %v91_v11 = vld [vmem:[#allocation8 + $0x30] sm:$0xff]  ;;  %s602_s3 = smov [#allocation10]  }
  0x4c   :  { %v416_v10 = vpack.c.bf16 %v90_v9, %v89_v8  ;;  %v92_v12 = vld [vmem:[#allocation8 + $0x38] sm:$0xff]  ;;  %v93_v14 = vld [vmem:[#allocation8 + $0x40] sm:$0xff]  ;;  %v94_v15 = vld [vmem:[#allocation8 + $0x48] sm:$0xff]  ;;  %s294_s10 = sshll.u32 %s602_s3, 4  ;;  %s295_s10 = int_to_ptr.vmem [resolvable:$true] %s294_s10 }
  0x4d   :  { %411 = vmatpush3.bf16.msra.mxu0 %v410_v5  ;;  %435 = vmatpush3.bf16.msra.mxu1 %v410_v5  ;;  %v419_v13 = vpack.c.bf16 %v92_v12, %v91_v11  ;;  %v422_v16 = vpack.c.bf16 %v94_v15, %v93_v14  ;;  %v95_v17 = vld [vmem:[#allocation8 + $0x50] sm:$0xff]  ;;  %v96_v18 = vld [vmem:[#allocation8 + $0x58] sm:$0xff]  ;;  %v97_v20 = vld [vmem:[#allocation8 + $0x60] sm:$0xff]  ;;  %s563_s1 = scalar_lea.vmem %s295_s10, 16  ;;  %s567_s11 = scalar_lea.vmem %s295_s10, 32 }
  0x4e   :  { %412 = vmatprep.subr.bf16.mxu0 %v599_v0  ;;  %436 = vmatprep.subr.bf16.mxu1 %v599_v0  ;;  %v425_v19 = vpack.c.bf16 %v96_v18, %v95_v17  ;;  %v98_v21 = vld [vmem:[#allocation8 + $0x68] sm:$0xff]  ;;  %v84_v23 = vld [vmem:[#allocation2] sm:$0x3]  ;;  %v101_v24 = vld [vmem:[#allocation5] sm:$0x3]  ;;  %p564_p4 = scmp.ne.s32.totalorder %s295_s10, %s563_s1  ;;  %p568_p5 = scmp.lt.s32.totalorder %s295_s10, %s295_s10 }
  0x4f   :  { %v428_v22 = vpack.c.bf16 %v98_v21, %v97_v20  ;;  %v174_v25 = vld [vmem:[#allocation7] sm:$0x3]  ;;  %v99_v26 = vld [vmem:[#allocation8 + $0x70] sm:$0xff]  ;;  %v102_v28 = vsub.f32 %v84_v23, %v101_v24  ;;  %p569_p6 = scmp.lt.s32.totalorder %s567_s11, %s563_s1 }
  0x50   :  { %v100_v27 = vld [vmem:[#allocation8 + $0x78] sm:$0xff]  ;;  %v175_v29 = vsub.f32 %v84_v23, %v174_v25 }
  0x51   :  { %414 = vmatpush3.bf16.msra.mxu0 %v413_v7  ;;  %438 = vmatpush3.bf16.msra.mxu1 %v413_v7  ;;  %v431_v30 = vpack.c.bf16 %v100_v27, %v99_v26  ;;  %v103_v31 = vmul.f32 %v102_v28, %v102_v28  ;;  %v277_v4 = vld [vmem:[#allocation10] sm:$0x1]  ;;  %p570_p7 = por %p569_p6, %p568_p5 }
  0x52   :  { %415 = vmatprep.subr.bf16.mxu0 %v599_v0  ;;  %439 = vmatprep.subr.bf16.mxu1 %v599_v0  ;;  %v176_v32 = vmul.f32 %v175_v29, %v175_v29 }
  0x53   :  { %p571_p8 = pnand %p570_p7, %p564_p4 }
  0x55   :  { %417 = vmatpush3.bf16.msra.mxu0 %v416_v10  ;;  %441 = vmatpush3.bf16.msra.mxu1 %v416_v10 }
  0x56   :  { %418 = vmatprep.subr.bf16.mxu0 %v599_v0  ;;  %442 = vmatprep.subr.bf16.mxu1 %v599_v0 }
  0x59   :  { %420 = vmatpush3.bf16.msra.mxu0 %v419_v13  ;;  %444 = vmatpush3.bf16.msra.mxu1 %v419_v13 }
  0x5a   :  { %421 = vmatprep.subr.bf16.mxu0 %v599_v0  ;;  %445 = vmatprep.subr.bf16.mxu1 %v599_v0 }
  0x5d   :  { %423 = vmatpush3.bf16.msra.mxu0 %v422_v16  ;;  %447 = vmatpush3.bf16.msra.mxu1 %v422_v16 }
  0x5e   :  { %424 = vmatprep.subr.bf16.mxu0 %v599_v0  ;;  %448 = vmatprep.subr.bf16.mxu1 %v599_v0 }
  0x61   :  { %426 = vmatpush3.bf16.msra.mxu0 %v425_v19  ;;  %450 = vmatpush3.bf16.msra.mxu1 %v425_v19 }
  0x62   :  { %427 = vmatprep.subr.bf16.mxu0 %v599_v0  ;;  %451 = vmatprep.subr.bf16.mxu1 %v599_v0 }
  0x65   :  { %429 = vmatpush3.bf16.msra.mxu0 %v428_v22  ;;  %453 = vmatpush3.bf16.msra.mxu1 %v428_v22 }
  0x66   :  { %430 = vmatprep.subr.bf16.mxu0 %v599_v0  ;;  %454 = vmatprep.subr.bf16.mxu1 %v599_v0 }
  0x69   :  { %432 = vmatpush3.bf16.msra.mxu0 %v431_v30  ;;  %456 = vmatpush3.bf16.msra.mxu1 %v431_v30 }
  0x6c   :  { %372 = vmatmul.mubr.f32.vlgmr.msra.gmra.mrb[0].mxu0 %v103_v31  ;;  %407 = vmatmul.mubr.f32.vlgmr.msra.gmra.mrb[0].mxu1 %v176_v32 }
 0x13f   :  { %v170_v33 = vpop.f32.mrb[0].mxu0  ;;  %v243_v34 = vpop.f32.mrb[0].mxu1 }
 0x140   :  { %467 = vrsqrt.f32 %v170_v33  ;;  %v373_v35 = vpop.f32.mrb[1].mxu0  ;;  %v408_v36 = vpop.f32.mrb[1].mxu1  ;;  %vm249_vm1 = vcmp.eq.f32.partialorder %v170_v33, inf  ;;  %v252_v40 = vand.u32 2147483648, %v170_v33  ;;  %vm251_vm2 = vcmp.eq.f32.partialorder %v170_v33, 0.0 }
 0x141   :  { %469 = vrsqrt.f32 %v243_v34  ;;  %vm256_vm3 = vcmp.eq.f32.partialorder %v243_v34, inf  ;;  %v259_v43 = vand.u32 2147483648, %v243_v34  ;;  %vm258_vm4 = vcmp.eq.f32.partialorder %v243_v34, 0.0 }
 0x14a   :  { %v468_v37 = vpop.eup %467 }
 0x14b   :  { %v470_v38 = vpop.eup %469  ;;  %v248_v39 = vmul.f32 %v468_v37, %v170_v33 }
 0x14c   :  { %v255_v41 = vmul.f32 %v470_v38, %v243_v34 }
 0x14d   :  { %v250_v42 = vsel %vm249_vm1, %v170_v33, %v248_v39 }
 0x14e   :  { %v253_v44 = vsel %vm251_vm2, %v252_v40, %v250_v42  ;;  %v257_v45 = vsel %vm256_vm3, %v243_v34, %v255_v41 }
 0x14f   :  { %v260_v46 = vsel %vm258_vm4, %v259_v43, %v257_v45 }
 0x150   :  { %v261_v47 = vsub.f32 %v253_v44, %v260_v46 }
 0x152   :  { %v263_v48 = vand.u32 2147483647, %v261_v47  ;;  %v262_v59 = vmax.f32 %v261_v47, 0.0 }
 0x154   :  { %v264_v49 = vsub.f32 0.0, %v263_v48 }
 0x156   :  { %v265_v50 = vmul.f32 1.442695, %v264_v49 }
 0x158   :  { %471 = vpow2.f32 %v265_v50 }
 0x162   :  { %v472_v51 = vpop.eup %471 }
 0x163   :  { %v267_v52 = vadd.f32 1.0, %v472_v51  ;;  %v270_v53 = vmul.f32 -0.5, %v472_v51  ;;  %v273_v55 = vand.u32 2147483647, %v472_v51 }
 0x165   :  { %473 = vlog2.f32 %v267_v52  ;;  %v271_v54 = vadd.f32 1.0, %v270_v53  ;;  %vm274_vm5 = vcmp.lt.f32.partialorder %v273_v55, 0.0004427343 }
 0x167   :  { %v272_v58 = vmul.f32 %v472_v51, %v271_v54 }
 0x16f   :  { %v474_v56 = vpop.eup %473 }
 0x170   :  { %v269_v57 = vmul.f32 0.6931472, %v474_v56 }
 0x172   :  { %v275_v60 = vsel %vm274_vm5, %v272_v58, %v269_v57 }
 0x173   :  { %v276_v61 = vadd.f32 %v275_v60, %v262_v59 }
 0x175   :  { %v279_v62 = vsel %vm278_vm6, %v276_v61, 0.0 }
 0x176   :  { %v280_v63 = vrot.slane %v279_v62, 4 }
 0x178   :  { %v281_v0 = vadd.f32 %v280_v63, %v279_v62 }
 0x17a   :  { %v282_v1 = vrot.slane %v281_v0, 2 }
 0x17c   :  { %v283_v2 = vadd.f32 %v282_v1, %v281_v0 }
 0x17e   :  { %v284_v3 = vrot.slane %v283_v2, 1 }
 0x180   :  { %v285_v5 = vadd.f32 %v284_v3, %v283_v2 }
 0x182   :  { %v286_v6 = vadd.f32 %v285_v5, %v277_v4 }
 0x184   :  { %287 = vst [vmem:[#allocation10] sm:$0x1] %v286_v6 }
 0x185   :  { %574 = shalt.err (!%p571_p8)
}
 0x186   :  { %s575_s14 = scalar_lea.hbm %s715_s4, 16 }
 0x187   :  { %p576_p9 = scmp.ne.s32.totalorder %s715_s4, %s575_s14  ;;  %p579_p10 = scmp.lt.u32.totalorder %s575_s14, %s715_s4 }
 0x189   :  { %p581_p11 = pnand %p579_p10, %p576_p9 }
 0x18b   :  { %584 = shalt.err (!%p581_p11)
}
 0x18c   :  { %297 = dma.vmem_to_hbm [thread:$0]  %s295_s10, 16, %s715_s4, [#allocation4]  }
 0x18d   :  { %591 = dma.done.wait [#allocation4], 16  }
 0x18e   :  { %592 = vsyncadd [#allocation4], 4294967280 }
 0x18f   :  { %301 = vsyncpa [#allocation3], 1 }
 0x190   :  { %302 = vsyncpa [#allocation6], 1 }
 0x191   :  { %303 = vsyncpa [#allocation9], 1 }
 0x192   :  { %304 = vsyncpa [#allocation4], 1 }

</bundles_post_ra>
